<compile_context>
chip_gen: v7x
topology: tpu7x:2x2x1
jax: 0.10.0
libtpu: 0.0.40
codegen_flags: <defaults>
</compile_context>

<pallas_src>
import math

import jax
import jax.numpy as jnp
from jax import lax
from jax.experimental import pallas as pl
from jax.experimental.pallas import tpu as pltpu


_INV_SQRT2 = 1.0 / math.sqrt(2.0)

# Problems whose whole working set is below this take the no-grid fast path.
_SINGLE_BLOCK_BYTES = 2 << 20


def _gelu_exact(y):
    # nn.GELU() default (approximate='none'): 0.5 * y * (1 + erf(y / sqrt(2)))
    # TODO(synk): tanh-approx GELU would run on the EUP slot (cheaper when the
    # finalize executes every step) but changes approximate='none' semantics.
    return 0.5 * y * (1.0 + lax.erf(y * jnp.float32(_INV_SQRT2)))


# ---------------------------------------------------------------------------
# Kernels
# ---------------------------------------------------------------------------

def _kernel_single_block(x_ref, w_ref, b_ref, o_ref):
    """No grid: whole (padded) problem as one VMEM block."""
    y = jnp.dot(x_ref[...], w_ref[...], preferred_element_type=jnp.float32)
    y = y + b_ref[...].astype(jnp.float32)
    o_ref[...] = _gelu_exact(y).astype(o_ref.dtype)


def _kernel_single_k(x_ref, w_ref, b_ref, o_ref):
    """2-D grid (B tiles, N tiles): K is a single step, direct write."""
    y = jnp.dot(x_ref[...], w_ref[...], preferred_element_type=jnp.float32)
    y = y + b_ref[...].astype(jnp.float32)
    o_ref[...] = _gelu_exact(y).astype(o_ref.dtype)


def _kernel_multi_k_inplace(x_ref, w_ref, b_ref, o_ref):
    """3-D grid (B, N, K tiles), f32 output accumulated in place (no scratch)."""
    k = pl.program_id(2)
    part = jnp.dot(x_ref[...], w_ref[...], preferred_element_type=jnp.float32)

    @pl.when(k == 0)
    def _():                       # assign-on-first-k: no zero-fill pass
        o_ref[...] = part

    @pl.when(k > 0)
    def _():
        o_ref[...] += part

    @pl.when(k == pl.num_programs(2) - 1)
    def _():
        y = o_ref[...] + b_ref[...].astype(jnp.float32)
        o_ref[...] = _gelu_exact(y).astype(o_ref.dtype)


def _kernel_multi_k_scratch(x_ref, w_ref, b_ref, o_ref, acc_ref):
    """3-D grid, sub-32-bit output dtype: accumulate in an f32 VMEM scratch."""
    k = pl.program_id(2)
    part = jnp.dot(x_ref[...], w_ref[...], preferred_element_type=jnp.float32)

    @pl.when(k == 0)
    def _():
        acc_ref[...] = part

    @pl.when(k > 0)
    def _():
        acc_ref[...] += part

    @pl.when(k == pl.num_programs(2) - 1)
    def _():
        y = acc_ref[...] + b_ref[...].astype(jnp.float32)
        o_ref[...] = _gelu_exact(y).astype(o_ref.dtype)


# ---------------------------------------------------------------------------
# Host-side helpers
# ---------------------------------------------------------------------------

def _cdiv(a, b):
    return -(-a // b)


def _round_up(x, m):
    return ((x + m - 1) // m) * m


def _largest_divisor_tile(total, candidates):
    for c in candidates:
        if total % c == 0:
            return c
    return total


def _sublane_multiple(*dtypes):
    m = 8
    for dt in dtypes:
        m = max(m, 32 // max(1, jnp.dtype(dt).itemsize))
    return m


def _vmem_budget():
    """(working-set budget, scoped vmem limit, max batch tile) per generation."""
    budget, limit, max_tb = 24 << 20, 32 << 20, 512   # safe on v7x (64 MiB/TC)
    try:
        info = pltpu.get_tpu_info()
        cap = 0
        for name in ("vmem_capacity_bytes", "vmem_size_bytes", "vmem_bytes"):
            cap = int(getattr(info, name, 0) or 0)
            if cap:
                break
        if cap >= (100 << 20):                        # v5e / v6e: 128 MiB
            budget, limit, max_tb = 64 << 20, 96 << 20, 1024
    except Exception:
        pass
    return budget, limit, max_tb


# ---------------------------------------------------------------------------
# Public wrapper
# ---------------------------------------------------------------------------

def linear_discriminator_block(x, w, b, *, use_bf16_matmul=False):
    """x: [..., inp], w: [inp, oup], b: [oup] -> GELU(x @ w + b), [..., oup]."""
    inp = x.shape[-1]
    inp_w, oup = w.shape
    assert inp == inp_w, (inp, inp_w)
    assert b.shape == (oup,), b.shape

    lead_shape = x.shape[:-1]
    x2 = x.reshape(-1, inp)
    B = x2.shape[0]
    out_dtype = x.dtype

    budget, vmem_limit, max_tile_b = _vmem_budget()

    # Lane-dense output: pad oup to a multiple of 128 (unmasked vst stores).
    oup_p = _round_up(oup, 128)
    w_p = w if oup_p == oup else jnp.pad(w, ((0, 0), (0, oup_p - oup)))
    b_p = (b if oup_p == oup else jnp.pad(b, (0, oup_p - oup))).reshape(1, oup_p)

    mm_dtype = jnp.bfloat16 if use_bf16_matmul else x2.dtype
    x_mm = x2.astype(mm_dtype)
    w_mm = w_p.astype(mm_dtype)

    it_x = jnp.dtype(mm_dtype).itemsize
    it_w = jnp.dtype(mm_dtype).itemsize
    it_o = jnp.dtype(out_dtype).itemsize
    it_b = jnp.dtype(b_p.dtype).itemsize

    # ---- Fast path: whole problem as a single block, no grid machinery ----
    single_bytes = (B * inp * it_x + inp * oup_p * it_w
                    + oup_p * it_b + B * oup_p * it_o)
    if single_bytes <= _SINGLE_BLOCK_BYTES:
        out_p = pl.pallas_call(
            _kernel_single_block,
            out_shape=jax.ShapeDtypeStruct((B, oup_p), out_dtype),
        )(x_mm, w_mm, b_p)
        return out_p[:, :oup].reshape(lead_shape + (oup,))

    # ---- Tiled path --------------------------------------------------------
    sub = _sublane_multiple(mm_dtype, out_dtype)

    # K tiling: tile when 128-aligned; zero-pad large unaligned K so it can be
    # tiled (numerically a no-op); small unaligned K stays a single full block.
    if inp % 128 == 0:
        inp_p = inp
        tile_k = _largest_divisor_tile(inp, (512, 256, 128))
    elif inp > 1024:
        inp_p = _round_up(inp, 128)
        tile_k = _largest_divisor_tile(inp_p, (512, 256, 128))
    else:
        inp_p = inp
        tile_k = inp
    if inp_p != inp:
        x_mm = jnp.pad(x_mm, ((0, 0), (0, inp_p - inp)))
        w_mm = jnp.pad(w_mm, ((0, inp_p - inp), (0, 0)))

    tile_n = _largest_divisor_tile(oup_p, (1024, 512, 256, 128))

    # Balanced batch tile (minimize padding waste), capped per-generation.
    n_b_tiles = max(1, _cdiv(B, max_tile_b))
    tile_b = _round_up(_cdiv(B, n_b_tiles), sub)
    tile_b = max(sub, min(tile_b, _round_up(max_tile_b, sub)))

    inplace_acc = jnp.dtype(out_dtype) == jnp.dtype(jnp.float32)

    def _vmem_bytes(tb, tn, tk):
        return (2 * tb * tk * it_x            # x (double-buffered)
                + 2 * tk * tn * it_w          # w (double-buffered)
                + 2 * tn * it_b               # bias
                + 2 * tb * tn * it_o          # out (double-buffered)
                + (0 if inplace_acc else tb * tn * 4))

    min_tk = 128 if inp_p % 128 == 0 else inp_p
    while _vmem_bytes(tile_b, tile_n, tile_k) > budget:
        if tile_b > sub:
            tile_b = max(sub, _round_up(tile_b // 2, sub))
        elif tile_n > 128:
            tile_n //= 2
        elif tile_k > min_tk:
            tile_k //= 2
        else:
            break

    B_p = _round_up(B, tile_b)
    gb = B_p // tile_b
    gn = oup_p // tile_n

    # Megacore guard: guarantee >=2 steps on a parallel axis for v7x's 2 TCs.
    if gb == 1 and gn == 1:
        if tile_n >= 256:
            tile_n //= 2
        elif tile_b >= 2 * sub and B > tile_b // 2:
            tile_b = max(sub, _round_up(tile_b // 2, sub))
            B_p = _round_up(B, tile_b)
        gb = B_p // tile_b
        gn = oup_p // tile_n

    gk = inp_p // tile_k

    if B_p != B:
        x_mm = jnp.pad(x_mm, ((0, B_p - B), (0, 0)))

    # Cost estimate accounting for x/W re-streaming across the output grid.
    cost = pl.CostEstimate(
        flops=2 * B_p * inp_p * oup_p,
        transcendentals=B_p * oup_p,
        bytes_accessed=(B_p * inp_p * it_x * gn
                        + inp_p * oup_p * it_w * gb
                        + oup_p * it_b
                        + B_p * oup_p * it_o),
    )
    cparams_2d = pltpu.CompilerParams(
        dimension_semantics=("parallel", "parallel"),
        vmem_limit_bytes=vmem_limit,
    )
    cparams_3d = pltpu.CompilerParams(
        dimension_semantics=("parallel", "parallel", "arbitrary"),
        vmem_limit_bytes=vmem_limit,
    )

    if gk == 1:
        out_p = pl.pallas_call(
            _kernel_single_k,
            out_shape=jax.ShapeDtypeStruct((B_p, oup_p), out_dtype),
            grid_spec=pltpu.PrefetchScalarGridSpec(
                num_scalar_prefetch=0,
                grid=(gb, gn),
                in_specs=[
                    pl.BlockSpec((tile_b, tile_k), lambda i, j: (i, 0)),
                    pl.BlockSpec((tile_k, tile_n), lambda i, j: (0, j)),
                    pl.BlockSpec((1, tile_n), lambda i, j: (0, j)),
                ],
                out_specs=pl.BlockSpec((tile_b, tile_n), lambda i, j: (i, j)),
            ),
            compiler_params=cparams_2d,
            cost_estimate=cost,
        )(x_mm, w_mm, b_p)
    else:
        kernel = _kernel_multi_k_inplace if inplace_acc else _kernel_multi_k_scratch
        scratch = [] if inplace_acc else [pltpu.VMEM((tile_b, tile_n), jnp.float32)]
        out_p = pl.pallas_call(
            kernel,
            out_shape=jax.ShapeDtypeStruct((B_p, oup_p), out_dtype),
            grid_spec=pltpu.PrefetchScalarGridSpec(
                num_scalar_prefetch=0,
                grid=(gb, gn, gk),
                in_specs=[
                    pl.BlockSpec((tile_b, tile_k), lambda i, j, k: (i, k)),
                    pl.BlockSpec((tile_k, tile_n), lambda i, j, k: (k, j)),
                    pl.BlockSpec((1, tile_n), lambda i, j, k: (0, j)),
                ],
                out_specs=pl.BlockSpec((tile_b, tile_n), lambda i, j, k: (i, j)),
                scratch_shapes=scratch,
            ),
            compiler_params=cparams_3d,
            cost_estimate=cost,
        )(x_mm, w_mm, b_p)

    return out_p[:B, :oup].reshape(lead_shape + (oup,))


# ---------------------------------------------------------------------------
# Reference + self-test
# ---------------------------------------------------------------------------

def _reference(x, w, b):
    y = x @ w + b
    return 0.5 * y * (1.0 + lax.erf(y / jnp.sqrt(2.0)))


def _make_inputs(key, B, INP, OUP):
    k_x, k_w, k_b = jax.random.split(key, 3)
    x = jax.random.normal(k_x, (B, INP), dtype=jnp.float32)
    bound = 1.0 / math.sqrt(INP)   # PyTorch default Linear init range
    w = jax.random.uniform(k_w, (INP, OUP), dtype=jnp.float32,
                           minval=-bound, maxval=bound)
    b = jax.random.uniform(k_b, (OUP,), dtype=jnp.float32,
                           minval=-bound, maxval=bound)
    return x, w, b


if __name__ == "__main__":
    key = jax.random.PRNGKey(0)
    k0, k1, k2 = jax.random.split(key, 3)

    # 1) Module-consistent small shapes (Linear(32, 64), batch 8): fast path.
    x, w, b = _make_inputs(k0, 8, 32, 64)
    out = jax.block_until_ready(linear_discriminator_block(x, w, b))
    ref = _reference(x, w, b)
    assert out.shape == (8, 64)
    assert jnp.allclose(out, ref, atol=1e-5, rtol=1e-5), "fast-path mismatch"

    # 2) Single-K tiled path (2-D parallel grid).
    x, w, b = _make_inputs(k1, 512, 512, 384)
    out = jax.block_until_ready(linear_discriminator_block(x, w, b))
    ref = _reference(x, w, b)
    assert out.shape == (512, 384)
    assert jnp.allclose(out, ref, atol=1e-3, rtol=1e-3), "single-K mismatch"

    # 3) Multi-K tiled path (in-place f32 accumulation over K).
    x, w, b = _make_inputs(k2, 256, 1024, 256)
    out = jax.block_until_ready(linear_discriminator_block(x, w, b))
    ref = _reference(x, w, b)
    assert out.shape == (256, 256)
    assert jnp.allclose(out, ref, atol=1e-3, rtol=1e-3), "multi-K mismatch"

    print("KERNEL_OK")
</pallas_src>

<mosaic_0001>
module attributes {stable_mosaic.version = 11 : i64} {
  func.func @_kernel_single_block(%arg0: memref<8x32xf32, #tpu.memory_space<vmem>>, %arg1: memref<32x128xf32, #tpu.memory_space<vmem>>, %arg2: memref<1x128xf32, #tpu.memory_space<vmem>>, %arg3: memref<8x128xf32, #tpu.memory_space<vmem>>) attributes {dimension_semantics = [], scalar_prefetch = 0 : i64, scratch_operands = 0 : i64, tpu.core_type = #tpu.core_type<tc>} {
    %c0 = arith.constant 0 : index
    %c0_0 = arith.constant 0 : index
    %0 = vector.load %arg0[%c0, %c0_0] : memref<8x32xf32, #tpu.memory_space<vmem>>, vector<8x32xf32>
    %c0_1 = arith.constant 0 : index
    %c0_2 = arith.constant 0 : index
    %1 = vector.load %arg1[%c0_1, %c0_2] : memref<32x128xf32, #tpu.memory_space<vmem>>, vector<32x128xf32>
    %cst = arith.constant dense<0.000000e+00> : vector<8x128xf32>
    %2 = tpu.matmul %0, %1, %cst {dimension_numbers = #tpu.dot_dimension_numbers<[1], [0], [0], [1], [0, 0, 1, 1], [], []>} : vector<8x32xf32>, vector<32x128xf32>, vector<8x128xf32> -> vector<8x128xf32>
    %c0_3 = arith.constant 0 : index
    %c0_4 = arith.constant 0 : index
    %3 = vector.load %arg2[%c0_3, %c0_4] : memref<1x128xf32, #tpu.memory_space<vmem>>, vector<1x128xf32>
    %4 = vector.broadcast %3 : vector<1x128xf32> to vector<8x128xf32>
    %5 = arith.addf %2, %4 : vector<8x128xf32>
    %cst_5 = arith.constant 5.000000e-01 : f32
    %6 = vector.broadcast %cst_5 : f32 to vector<8x128xf32>
    %7 = arith.mulf %6, %5 : vector<8x128xf32>
    %cst_6 = arith.constant 0.707106769 : f32
    %8 = vector.broadcast %cst_6 : f32 to vector<8x128xf32>
    %9 = arith.mulf %5, %8 : vector<8x128xf32>
    %10 = math.erf %9 : vector<8x128xf32>
    %cst_7 = arith.constant 1.000000e+00 : f32
    %11 = vector.broadcast %cst_7 : f32 to vector<8x128xf32>
    %12 = arith.addf %11, %10 : vector<8x128xf32>
    %13 = arith.mulf %7, %12 : vector<8x128xf32>
    %c0_8 = arith.constant 0 : index
    %c0_9 = arith.constant 0 : index
    %14 = vector.load %arg3[%c0_8, %c0_9] : memref<8x128xf32, #tpu.memory_space<vmem>>, vector<8x128xf32>
    tpu.vector_store %arg3[%c0_8, %c0_9], %13 {strides = array<i32>} : memref<8x128xf32, #tpu.memory_space<vmem>>, vector<8x128xf32>,
    return
  }
}

</mosaic_0001>

<bundles_post_ra>
// kernel: tpu_custom_call.1
= control target key start
LH: loop header
LB: loop body
LE: loop exit
PB: predicated region body
PF: predicated region fallthrough
CT: control target
= control target key end

     0   :  { %8 = vsyncpa [#allocation3], 0  ;;  %s329_s0 = inlined_call_operand.hbm [shape: f32[8,32], index: 0, kind: input, shape index: {}]   ;;  %s330_s1 = inlined_call_operand.hbm [shape: f32[32,128], index: 1, kind: input, shape index: {}]   ;;  %s331_s2 = inlined_call_operand.vmem [shape: f32[1,128], index: 2, kind: input, shape index: {}]   ;;  %s332_s3 = inlined_call_operand.hbm [shape: f32[8,128], index: 3, kind: output, shape index: {}]  }
   0x1   :  { %9 = vsyncpa [#allocation6], 0 }
   0x2   :  { %10 = vsyncpa [#allocation4], 0  ;;  %s255_s12 = smov [#allocation2]   ;;  %s256_s14 = smov [#allocation5]  }
   0x3   :  { %s17_s13 = sshll.u32 %s255_s12, 4  ;;  %s26_s15 = sshll.u32 %s256_s14, 4  ;;  %s18_s13 = int_to_ptr.vmem [resolvable:$true] %s17_s13  ;;  %s283_s15 = int_to_ptr.vmem [resolvable:$true] %s26_s15 }
   0x4   :  { %s183_s18 = scalar_lea.hbm %s329_s0, 128 }
   0x5   :  { %p184_p0 = scmp.ne.s32.totalorder %s329_s0, %s183_s18  ;;  %p187_p1 = scmp.lt.u32.totalorder %s183_s18, %s329_s0 }
   0x7   :  { %p189_p2 = pnand %p187_p1, %p184_p0 }
   0x9   :  { %192 = shalt.err (!%p189_p2)
}
   0xa   :  { %s193_s23 = scalar_lea.vmem %s18_s13, 128  ;;  %p198_p4 = scmp.lt.s32.totalorder %s18_s13, %s18_s13 }
   0xb   :  { %p194_p3 = scmp.ne.s32.totalorder %s18_s13, %s193_s23  ;;  %p199_p5 = scmp.lt.s32.totalorder %s193_s23, %s193_s23 }
   0xd   :  { %p200_p6 = por %p199_p5, %p198_p4 }
   0xf   :  { %p201_p7 = pnand %p200_p6, %p194_p3 }
  0x11   :  { %204 = shalt.err (!%p201_p7)
}
  0x12   :  { %20 = dma.hbm_to_vmem [thread:$0]  %s329_s0, 128, %s18_s13, [#allocation3]  }
  0x13   :  { %s205_s28 = scalar_lea.hbm %s330_s1, 512 }
  0x14   :  { %p206_p8 = scmp.ne.s32.totalorder %s330_s1, %s205_s28  ;;  %p209_p9 = scmp.lt.u32.totalorder %s205_s28, %s330_s1 }
  0x16   :  { %p211_p10 = pnand %p209_p9, %p206_p8 }
  0x18   :  { %214 = shalt.err (!%p211_p10)
}
  0x19   :  { %s215_s6 = scalar_lea.vmem %s283_s15, 512  ;;  %p220_p12 = scmp.lt.s32.totalorder %s283_s15, %s283_s15 }
  0x1a   :  { %p216_p11 = scmp.ne.s32.totalorder %s283_s15, %s215_s6  ;;  %p221_p13 = scmp.lt.s32.totalorder %s215_s6, %s215_s6 }
  0x1c   :  { %p222_p0 = por %p221_p13, %p220_p12 }
  0x1e   :  { %p223_p1 = pnand %p222_p0, %p216_p11 }
  0x20   :  { %226 = shalt.err (!%p223_p1)
}
  0x21   :  { %s257_s0 = smov 128   ;;  %s258_s7 = smov 8  }
  0x22   :  { %32 = dma.hbm_to_vmem [thread:$0]  %s330_s1, 512, %s283_s15, [#allocation6], %s257_s0, %s257_s0, %s258_s7  }
  0x23   :  { %249 = dma.done.wait [#allocation3], 128  }
  0x24   :  { %250 = vsyncadd [#allocation3], 4294967168 }
  0x25   :  { %251 = dma.done.wait [#allocation6], 512  }
  0x26   :  { %252 = vsyncadd [#allocation6], 4294966784  ;;  %v259_v0 = vmov 0.0|0.0   ;;  %vm260_vm0 = vmmov 0   ;;  %v261_v1 = vmov 0.0   ;;  %v42_v2 = vld [vmem:[#allocation5] sm:$0xff] }
  0x27   :  { %167 = vmatprep.subr.bf16.mxu0 %v259_v0  ;;  %164 = vmatprep.mubr.msk.f32.mxu0 %vm260_vm0, %v261_v1  ;;  %v43_v3 = vld [vmem:[#allocation5 + $0x8] sm:$0xff]  ;;  %v44_v4 = vld [vmem:[#allocation5 + $0x10] sm:$0xff]  ;;  %v45_v6 = vld [vmem:[#allocation5 + $0x18] sm:$0xff]  ;;  %vm53_vm1 = vcmask 261120   ;;  %s262_s11 = smov [#allocation7]  }
  0x28   :  { %v168_v5 = vpack.c.bf16 %v43_v3, %v42_v2  ;;  %v171_v7 = vpack.c.bf16 %v45_v6, %v44_v4  ;;  %v41_v8 = vld [vmem:[#allocation2] sm:$0xff]  ;;  %s139_s12 = sshll.u32 %s262_s11, 4  ;;  %s140_s12 = int_to_ptr.vmem [resolvable:$true] %s139_s12 }
  0x29   :  { %v149_v9 = vld [vmem:[%s331_s2] ss:$0 sm:$0xff]  ;;  %s227_s13 = scalar_lea.vmem %s140_s12, 128  ;;  %p232_p3 = scmp.lt.s32.totalorder %s140_s12, %s140_s12 }
  0x2a   :  { %169 = vmatpush3.bf16.msra.mxu0 %v168_v5  ;;  %p228_p2 = scmp.ne.s32.totalorder %s140_s12, %s227_s13  ;;  %p233_p4 = scmp.lt.s32.totalorder %s227_s13, %s227_s13 }
  0x2b   :  { %170 = vmatprep.subr.bf16.mxu0 %v259_v0 }
  0x2c   :  { %p234_p5 = por %p233_p4, %p232_p3 }
  0x2e   :  { %172 = vmatpush3.bf16.msra.mxu0 %v171_v7  ;;  %p235_p6 = pnand %p234_p5, %p228_p2 }
  0x31   :  { %165 = vmatmul.mubr.msk.f32.vlgmr.msra.gmra.mrb[0].mxu0 %vm53_vm1, %v41_v8 }
 0x104   :  { %v123_v10 = vpop.f32.mrb[0].mxu0 }
 0x105   :  { %v124_v11 = vadd.f32 %v149_v9, %v123_v10  ;;  %v166_v12 = vpop.f32.mrb[1].mxu0 }
 0x107   :  { %v128_v13 = vmul.f32 0.70710677, %v124_v11  ;;  %v127_v15 = vmul.f32 0.5, %v124_v11 }
 0x109   :  { %181 = verf.f32 %v128_v13 }
 0x113   :  { %v182_v14 = vpop.eup %181 }
 0x114   :  { %v130_v16 = vadd.f32 1.0, %v182_v14 }
 0x116   :  { %v131_v17 = vmul.f32 %v130_v16, %v127_v15 }
 0x118   :  { %132 = vst [vmem:[#allocation7] sm:$0xff] %v131_v17 }
 0x119   :  { %238 = shalt.err (!%p235_p6)
}
 0x11a   :  { %s239_s15 = scalar_lea.hbm %s332_s3, 128 }
 0x11b   :  { %p240_p7 = scmp.ne.s32.totalorder %s332_s3, %s239_s15  ;;  %p243_p8 = scmp.lt.u32.totalorder %s239_s15, %s332_s3 }
 0x11d   :  { %p245_p9 = pnand %p243_p8, %p240_p7 }
 0x11f   :  { %248 = shalt.err (!%p245_p9)
}
 0x120   :  { %142 = dma.vmem_to_hbm [thread:$0]  %s140_s12, 128, %s332_s3, [#allocation4]  }
 0x121   :  { %253 = dma.done.wait [#allocation4], 128  }
 0x122   :  { %254 = vsyncadd [#allocation4], 4294967168 }
 0x123   :  { %146 = vsyncpa [#allocation3], 1 }
 0x124   :  { %147 = vsyncpa [#allocation6], 1 }
 0x125   :  { %148 = vsyncpa [#allocation4], 1 }

</bundles_post_ra>
